<compile_context>
chip_gen: v6e
topology: v6e:2x2x1
jax: 0.10.0
libtpu: 0.0.40
codegen_flags: <defaults>
</compile_context>

<pallas_src>
import jax
import jax.numpy as jnp
from jax.experimental import pallas as pl
from jax.experimental.pallas import tpu as pltpu

NUM_CLASSES = 69
NDF = 64
CPAD = 128        # input channels (69) padded to one lane width
H1PAD = 128       # ndf=64 head width padded to one lane width
OUT_LANES = 128   # lane-padded classifier output width

# Bias packing offsets inside the single [1, 1152] bias buffer.
_B01_OFF, _B2_OFF, _B3_OFF, _B4_OFF, _BC_OFF, _B_END = 0, 128, 256, 512, 1024, 1152


def _leaky_relu(v):
    return jnp.where(v >= 0, v, 0.2 * v)


def _disc_head_kernel(x_ref, wA_ref, w3t_ref, w4t_ref, wct_ref, bias_ref, out_ref):
    # x_ref: [BB, CPAD] pooled features (GAP already applied in the wrapper).
    x = x_ref[...]

    # Folded conv0*conv1 (exact: conv0 -> GAP -> conv1 is a pure linear chain),
    # then the LeakyReLU that follows conv1 in the original module.
    h = _leaky_relu(
        jnp.dot(x, wA_ref[:, 0:H1PAD], preferred_element_type=jnp.float32)
        + bias_ref[:, _B01_OFF:_B2_OFF])
    # conv2
    h = _leaky_relu(
        jnp.dot(h, wA_ref[:, H1PAD:2 * H1PAD], preferred_element_type=jnp.float32)
        + bias_ref[:, _B2_OFF:_B3_OFF])
    # conv3
    h = _leaky_relu(
        jnp.dot(h, w3t_ref[...], preferred_element_type=jnp.float32)
        + bias_ref[:, _B3_OFF:_B4_OFF])
    # conv4
    h = _leaky_relu(
        jnp.dot(h, w4t_ref[...], preferred_element_type=jnp.float32)
        + bias_ref[:, _B4_OFF:_BC_OFF])
    # classifier (ndf*8 -> 1), lane-padded to 128 so the store is lane-dense.
    out_ref[...] = (jnp.dot(h, wct_ref[...], preferred_element_type=jnp.float32)
                    + bias_ref[:, _BC_OFF:_B_END])


def init_params(key, num_classes=NUM_CLASSES, ndf=NDF):
    dims = [(ndf * 32, num_classes),  # conv
            (ndf, ndf * 32),          # conv1
            (ndf * 2, ndf),           # conv2
            (ndf * 4, ndf * 2),       # conv3
            (ndf * 8, ndf * 4),       # conv4
            (1, ndf * 8)]             # classifier
    params = []
    keys = jax.random.split(key, len(dims))
    for k, (co, ci) in zip(keys, dims):
        kw, kb = jax.random.split(k)
        scale = 1.0 / jnp.sqrt(jnp.float32(ci))
        w = jax.random.normal(kw, (co, ci), jnp.float32) * scale
        b = jax.random.normal(kb, (co,), jnp.float32) * 0.01
        params += [w, b]
    return tuple(params)


def prepare_params(params):
    """One-time weight prep (fold conv0 into conv1, transpose, pad, pack).

    Run once at setup; the per-call hot path only does the GAP + pallas_call.
    """
    w0, b0, w1, b1, w2, b2, w3, b3, w4, b4, wc, bc = params
    C = w0.shape[1]

    # Fold conv0 into conv1: pooled @ w0t @ w1t + (b0 @ w1t + b1).
    w0t = jnp.pad(w0.T.astype(jnp.float32), ((0, CPAD - C), (0, 0)))     # [128, 2048]
    w01t = w0t @ w1.T.astype(jnp.float32)                                # [128, 64]
    w01t = jnp.pad(w01t, ((0, 0), (0, H1PAD - w01t.shape[1])))           # [128, 128]
    b01 = b0.astype(jnp.float32) @ w1.T.astype(jnp.float32) + b1         # [64]
    b01 = jnp.pad(b01, (0, H1PAD - b01.shape[0]))                        # [128]

    w2t = jnp.pad(w2.T, ((0, H1PAD - w2.shape[1]), (0, 0)))              # [128, 128]
    wA = jnp.concatenate([w01t, w2t], axis=1)                            # [128, 256]

    w3t = w3.T                                                           # [128, 256]
    w4t = w4.T                                                           # [256, 512]
    wct = jnp.pad(wc.T, ((0, 0), (0, OUT_LANES - 1)))                    # [512, 128]

    bct = jnp.pad(bc.reshape(1), (0, OUT_LANES - 1))                     # [128]
    biases = jnp.concatenate([b01, b2, b3, b4, bct]).reshape(1, -1)      # [1, 1152]

    return wA, w3t, w4t, wct, biases


def attention_discriminator_pallas(x_nchw, packed):
    wA, w3t, w4t, wct, biases = packed
    B, C, H, W = x_nchw.shape

    # Batch tiling: single step for small batches, 128-row blocks (sharded
    # across TensorCores on v7x via "parallel") for large batches.
    if B <= 128:
        BB = max(8, ((B + 7) // 8) * 8)
        BPAD = BB
    else:
        BB = 128
        BPAD = ((B + 127) // 128) * 128
    num_blocks = BPAD // BB

    # Global average pool hoisted into the wrapper (exact: GAP and conv0 are linear).
    pooled = jnp.mean(x_nchw.astype(jnp.float32), axis=(2, 3))           # [B, C]
    pooled = jnp.pad(pooled, ((0, BPAD - B), (0, CPAD - C)))             # [BPAD, CPAD]

    const = lambda arr: pl.BlockSpec(arr.shape, lambda i: (0, 0))

    out = pl.pallas_call(
        _disc_head_kernel,
        out_shape=jax.ShapeDtypeStruct((BPAD, OUT_LANES), jnp.float32),
        grid_spec=pltpu.PrefetchScalarGridSpec(
            num_scalar_prefetch=0,
            grid=(num_blocks,),
            in_specs=[
                pl.BlockSpec((BB, CPAD), lambda i: (i, 0)),   # pooled features
                const(wA),                                    # [128, 256] conv01 | conv2
                const(w3t),                                   # [128, 256]
                const(w4t),                                   # [256, 512]
                const(wct),                                   # [512, 128]
                const(biases),                                # [1, 1152]
            ],
            out_specs=pl.BlockSpec((BB, OUT_LANES), lambda i: (i, 0)),
        ),
        compiler_params=pltpu.CompilerParams(
            dimension_semantics=("parallel",)),
    )(pooled, wA, w3t, w4t, wct, biases)

    # Valid batch rows, valid classifier lane; final shape [B, 1, 1, 1] like PyTorch.
    return out[:B, :1].reshape(B, 1, 1, 1)


def attention_discriminator_ref(x_nchw, params):
    w0, b0, w1, b1, w2, b2, w3, b3, w4, b4, wc, bc = params

    def conv1x1(x, w, b):
        return jnp.einsum('bchw,oc->bohw', x, w) + b[None, :, None, None]

    lr = lambda v: jnp.where(v >= 0, v, 0.2 * v)
    y = conv1x1(x_nchw, w0, b0)
    y = jnp.mean(y, axis=(2, 3), keepdims=True)   # AdaptiveAvgPool2d((1,1))
    y = lr(conv1x1(y, w1, b1))
    y = lr(conv1x1(y, w2, b2))
    y = lr(conv1x1(y, w3, b3))
    y = lr(conv1x1(y, w4, b4))
    y = conv1x1(y, wc, bc)
    return y


if __name__ == "__main__":
    key = jax.random.PRNGKey(0)
    kx, kp = jax.random.split(key)

    B, H, W = 2, 8, 8
    x = jax.random.normal(kx, (B, NUM_CLASSES, H, W), jnp.float32)
    params = init_params(kp)

    # One-time weight prep (fold/transpose/pad/pack) outside the hot path.
    packed = jax.block_until_ready(prepare_params(params))

    fwd = jax.jit(attention_discriminator_pallas)
    out = jax.block_until_ready(fwd(x, packed))

    ref = attention_discriminator_ref(x, params)
    assert out.shape == (B, 1, 1, 1)
    assert jnp.allclose(out, ref, rtol=1e-3, atol=1e-3), (out, ref)

    print("KERNEL_OK")
</pallas_src>

<mosaic_0001>
module attributes {stable_mosaic.version = 11 : i64} {
  func.func @_disc_head_kernel(%arg0: i32, %arg1: memref<8x128xf32, #tpu.memory_space<vmem>>, %arg2: memref<128x256xf32, #tpu.memory_space<vmem>>, %arg3: memref<128x256xf32, #tpu.memory_space<vmem>>, %arg4: memref<256x512xf32, #tpu.memory_space<vmem>>, %arg5: memref<512x128xf32, #tpu.memory_space<vmem>>, %arg6: memref<1x1152xf32, #tpu.memory_space<vmem>>, %arg7: memref<8x128xf32, #tpu.memory_space<vmem>>) attributes {dimension_semantics = [#tpu.dimension_semantics<parallel>], iteration_bounds = array<i64: 1>, scalar_prefetch = 0 : i64, scratch_operands = 0 : i64, tpu.core_type = #tpu.core_type<tc>, window_params = [{transform_indices = @transform_0, window_bounds = array<i64: 8, 128>}, {pipeline_mode = #tpu.pipeline_mode<synchronous>, transform_indices = @transform_1, window_bounds = array<i64: 128, 256>}, {pipeline_mode = #tpu.pipeline_mode<synchronous>, transform_indices = @transform_2, window_bounds = array<i64: 128, 256>}, {pipeline_mode = #tpu.pipeline_mode<synchronous>, transform_indices = @transform_3, window_bounds = array<i64: 256, 512>}, {pipeline_mode = #tpu.pipeline_mode<synchronous>, transform_indices = @transform_4, window_bounds = array<i64: 512, 128>}, {pipeline_mode = #tpu.pipeline_mode<synchronous>, transform_indices = @transform_5, window_bounds = array<i64: 1, 1152>}, {transform_indices = @transform_6, window_bounds = array<i64: 8, 128>}]} {
    %c0 = arith.constant 0 : index
    %c0_0 = arith.constant 0 : index
    %0 = vector.load %arg1[%c0, %c0_0] : memref<8x128xf32, #tpu.memory_space<vmem>>, vector<8x128xf32>
    %c0_1 = arith.constant 0 : index
    %c0_2 = arith.constant 0 : index
    %1 = vector.load %arg2[%c0_1, %c0_2] : memref<128x256xf32, #tpu.memory_space<vmem>>, vector<128x128xf32>
    %cst = arith.constant dense<0.000000e+00> : vector<8x128xf32>
    %2 = tpu.matmul %0, %1, %cst {dimension_numbers = #tpu.dot_dimension_numbers<[1], [0], [0], [1], [0, 0, 1, 1], [], []>} : vector<8x128xf32>, vector<128x128xf32>, vector<8x128xf32> -> vector<8x128xf32>
    %c0_3 = arith.constant 0 : index
    %c0_4 = arith.constant 0 : index
    %3 = vector.load %arg6[%c0_3, %c0_4] : memref<1x1152xf32, #tpu.memory_space<vmem>>, vector<1x128xf32>
    %4 = vector.broadcast %3 : vector<1x128xf32> to vector<8x128xf32>
    %5 = arith.addf %2, %4 : vector<8x128xf32>
    %cst_5 = arith.constant 0.000000e+00 : f32
    %6 = vector.broadcast %cst_5 : f32 to vector<8x128xf32>
    %7 = arith.cmpf oge, %5, %6 : vector<8x128xf32>
    %cst_6 = arith.constant 2.000000e-01 : f32
    %8 = vector.broadcast %cst_6 : f32 to vector<8x128xf32>
    %9 = arith.mulf %8, %5 : vector<8x128xf32>
    %10 = arith.select %7, %5, %9 : vector<8x128xi1>, vector<8x128xf32>
    %c0_7 = arith.constant 0 : index
    %c128 = arith.constant 128 : index
    %11 = vector.load %arg2[%c0_7, %c128] : memref<128x256xf32, #tpu.memory_space<vmem>>, vector<128x128xf32>
    %cst_8 = arith.constant dense<0.000000e+00> : vector<8x128xf32>
    %12 = tpu.matmul %10, %11, %cst_8 {dimension_numbers = #tpu.dot_dimension_numbers<[1], [0], [0], [1], [0, 0, 1, 1], [], []>} : vector<8x128xf32>, vector<128x128xf32>, vector<8x128xf32> -> vector<8x128xf32>
    %c0_9 = arith.constant 0 : index
    %c128_10 = arith.constant 128 : index
    %13 = vector.load %arg6[%c0_9, %c128_10] : memref<1x1152xf32, #tpu.memory_space<vmem>>, vector<1x128xf32>
    %14 = vector.broadcast %13 : vector<1x128xf32> to vector<8x128xf32>
    %15 = arith.addf %12, %14 : vector<8x128xf32>
    %cst_11 = arith.constant 0.000000e+00 : f32
    %16 = vector.broadcast %cst_11 : f32 to vector<8x128xf32>
    %17 = arith.cmpf oge, %15, %16 : vector<8x128xf32>
    %cst_12 = arith.constant 2.000000e-01 : f32
    %18 = vector.broadcast %cst_12 : f32 to vector<8x128xf32>
    %19 = arith.mulf %18, %15 : vector<8x128xf32>
    %20 = arith.select %17, %15, %19 : vector<8x128xi1>, vector<8x128xf32>
    %c0_13 = arith.constant 0 : index
    %c0_14 = arith.constant 0 : index
    %21 = vector.load %arg3[%c0_13, %c0_14] : memref<128x256xf32, #tpu.memory_space<vmem>>, vector<128x256xf32>
    %cst_15 = arith.constant dense<0.000000e+00> : vector<8x256xf32>
    %22 = tpu.matmul %20, %21, %cst_15 {dimension_numbers = #tpu.dot_dimension_numbers<[1], [0], [0], [1], [0, 0, 1, 1], [], []>} : vector<8x128xf32>, vector<128x256xf32>, vector<8x256xf32> -> vector<8x256xf32>
    %c0_16 = arith.constant 0 : index
    %c256 = arith.constant 256 : index
    %23 = vector.load %arg6[%c0_16, %c256] : memref<1x1152xf32, #tpu.memory_space<vmem>>, vector<1x256xf32>
    %24 = vector.broadcast %23 : vector<1x256xf32> to vector<8x256xf32>
    %25 = arith.addf %22, %24 : vector<8x256xf32>
    %cst_17 = arith.constant 0.000000e+00 : f32
    %26 = vector.broadcast %cst_17 : f32 to vector<8x256xf32>
    %27 = arith.cmpf oge, %25, %26 : vector<8x256xf32>
    %cst_18 = arith.constant 2.000000e-01 : f32
    %28 = vector.broadcast %cst_18 : f32 to vector<8x256xf32>
    %29 = arith.mulf %28, %25 : vector<8x256xf32>
    %30 = arith.select %27, %25, %29 : vector<8x256xi1>, vector<8x256xf32>
    %c0_19 = arith.constant 0 : index
    %c0_20 = arith.constant 0 : index
    %31 = vector.load %arg4[%c0_19, %c0_20] : memref<256x512xf32, #tpu.memory_space<vmem>>, vector<256x512xf32>
    %cst_21 = arith.constant dense<0.000000e+00> : vector<8x512xf32>
    %32 = tpu.matmul %30, %31, %cst_21 {dimension_numbers = #tpu.dot_dimension_numbers<[1], [0], [0], [1], [0, 0, 1, 1], [], []>} : vector<8x256xf32>, vector<256x512xf32>, vector<8x512xf32> -> vector<8x512xf32>
    %c0_22 = arith.constant 0 : index
    %c512 = arith.constant 512 : index
    %33 = vector.load %arg6[%c0_22, %c512] : memref<1x1152xf32, #tpu.memory_space<vmem>>, vector<1x512xf32>
    %34 = vector.broadcast %33 : vector<1x512xf32> to vector<8x512xf32>
    %35 = arith.addf %32, %34 : vector<8x512xf32>
    %cst_23 = arith.constant 0.000000e+00 : f32
    %36 = vector.broadcast %cst_23 : f32 to vector<8x512xf32>
    %37 = arith.cmpf oge, %35, %36 : vector<8x512xf32>
    %cst_24 = arith.constant 2.000000e-01 : f32
    %38 = vector.broadcast %cst_24 : f32 to vector<8x512xf32>
    %39 = arith.mulf %38, %35 : vector<8x512xf32>
    %40 = arith.select %37, %35, %39 : vector<8x512xi1>, vector<8x512xf32>
    %c0_25 = arith.constant 0 : index
    %c0_26 = arith.constant 0 : index
    %41 = vector.load %arg5[%c0_25, %c0_26] : memref<512x128xf32, #tpu.memory_space<vmem>>, vector<512x128xf32>
    %cst_27 = arith.constant dense<0.000000e+00> : vector<8x128xf32>
    %42 = tpu.matmul %40, %41, %cst_27 {dimension_numbers = #tpu.dot_dimension_numbers<[1], [0], [0], [1], [0, 0, 1, 1], [], []>} : vector<8x512xf32>, vector<512x128xf32>, vector<8x128xf32> -> vector<8x128xf32>
    %c0_28 = arith.constant 0 : index
    %c1024 = arith.constant 1024 : index
    %43 = vector.load %arg6[%c0_28, %c1024] : memref<1x1152xf32, #tpu.memory_space<vmem>>, vector<1x128xf32>
    %44 = vector.broadcast %43 : vector<1x128xf32> to vector<8x128xf32>
    %45 = arith.addf %42, %44 : vector<8x128xf32>
    %c0_29 = arith.constant 0 : index
    %c0_30 = arith.constant 0 : index
    %46 = vector.load %arg7[%c0_29, %c0_30] : memref<8x128xf32, #tpu.memory_space<vmem>>, vector<8x128xf32>
    tpu.vector_store %arg7[%c0_29, %c0_30], %45 {strides = array<i32>} : memref<8x128xf32, #tpu.memory_space<vmem>>, vector<8x128xf32>,
    return
  }
  func.func @transform_0(%arg0: i32) -> (i32, i32) {
    %c0_i32 = arith.constant 0 : i32
    %c0_i32_0 = arith.constant 0 : i32
    return %arg0, %c0_i32 : i32, i32
  }
  func.func @transform_1(%arg0: i32) -> (i32, i32) {
    %c0_i32 = arith.constant 0 : i32
    %c0_i32_0 = arith.constant 0 : i32
    %c0_i32_1 = arith.constant 0 : i32
    return %c0_i32, %c0_i32_0 : i32, i32
  }
  func.func @transform_2(%arg0: i32) -> (i32, i32) {
    %c0_i32 = arith.constant 0 : i32
    %c0_i32_0 = arith.constant 0 : i32
    %c0_i32_1 = arith.constant 0 : i32
    return %c0_i32, %c0_i32_0 : i32, i32
  }
  func.func @transform_3(%arg0: i32) -> (i32, i32) {
    %c0_i32 = arith.constant 0 : i32
    %c0_i32_0 = arith.constant 0 : i32
    %c0_i32_1 = arith.constant 0 : i32
    return %c0_i32, %c0_i32_0 : i32, i32
  }
  func.func @transform_4(%arg0: i32) -> (i32, i32) {
    %c0_i32 = arith.constant 0 : i32
    %c0_i32_0 = arith.constant 0 : i32
    %c0_i32_1 = arith.constant 0 : i32
    return %c0_i32, %c0_i32_0 : i32, i32
  }
  func.func @transform_5(%arg0: i32) -> (i32, i32) {
    %c0_i32 = arith.constant 0 : i32
    %c0_i32_0 = arith.constant 0 : i32
    %c0_i32_1 = arith.constant 0 : i32
    return %c0_i32, %c0_i32_0 : i32, i32
  }
  func.func @transform_6(%arg0: i32) -> (i32, i32) {
    %c0_i32 = arith.constant 0 : i32
    %c0_i32_0 = arith.constant 0 : i32
    return %arg0, %c0_i32 : i32, i32
  }
}

</mosaic_0001>

<bundles_post_ra>
// kernel: attention_discriminator_pallas.1
= control target key start
LH: loop header
LB: loop body
LE: loop exit
PB: predicated region body
PF: predicated region fallthrough
CT: control target
= control target key end

     0   :  { %11 = vsyncpa [#allocation3], 0  ;;  %s1319_s0 = inlined_call_operand.vmem [shape: f32[8,128], index: 0, kind: input, shape index: {}]   ;;  %s1320_s1 = inlined_call_operand.hbm [shape: f32[128,256], index: 1, kind: input, shape index: {}]   ;;  %s1321_s2 = inlined_call_operand.hbm [shape: f32[128,256], index: 2, kind: input, shape index: {}]   ;;  %s1322_s3 = inlined_call_operand.hbm [shape: f32[256,512], index: 3, kind: input, shape index: {}]   ;;  %s1323_s4 = inlined_call_operand.hbm [shape: f32[512,128], index: 4, kind: input, shape index: {}]   ;;  %s1324_s5 = inlined_call_operand.vmem [shape: f32[1,1152], index: 5, kind: input, shape index: {}]   ;;  %s1325_s6 = inlined_call_operand.vmem [shape: f32[8,128], index: 6, kind: output, shape index: {}]  }
   0x1   :  { %12 = vsyncpa [#allocation5], 0 }
   0x2   :  { %13 = vsyncpa [#allocation8], 0  ;;  %s1190_s21 = smov [#allocation4]   ;;  %s1191_s23 = smov [#allocation2]  }
   0x3   :  { %s33_s22 = sshll.u32 %s1190_s21, 4  ;;  %s21_s24 = sshll.u32 %s1191_s23, 4  ;;  %s34_s22 = int_to_ptr.vmem [resolvable:$true] %s33_s22  ;;  %s22_s24 = int_to_ptr.vmem [resolvable:$true] %s21_s24 }
   0x4   :  { %s1112_s25 = scalar_lea.vmem %s34_s22, 4096  ;;  %p1117_p1 = scmp.lt.s32.totalorder %s34_s22, %s34_s22 }
   0x5   :  { %p1113_p0 = scmp.ne.s32.totalorder %s34_s22, %s1112_s25  ;;  %p1118_p2 = scmp.lt.s32.totalorder %s1112_s25, %s1112_s25 }
   0x7   :  { %p1119_p3 = por %p1118_p2, %p1117_p1 }
   0x9   :  { %p1120_p4 = pnand %p1119_p3, %p1113_p0 }
   0xb   :  { %1123 = shalt.err (!%p1120_p4)
}
   0xc   :  { %s1192_s26 = smov 256   ;;  %s1193_s27 = smov 16  }
   0xd   :  { %39 = dma.hbm_to_vmem [thread:$0]  %s1321_s2, 4096, %s34_s22, [#allocation5], %s1192_s26, %s1192_s26, %s1193_s27  }
   0xe   :  { %s1132_s30 = scalar_lea.vmem %s22_s24, 4096  ;;  %p1137_p6 = scmp.lt.s32.totalorder %s22_s24, %s22_s24 }
   0xf   :  { %p1133_p5 = scmp.ne.s32.totalorder %s22_s24, %s1132_s30  ;;  %p1138_p7 = scmp.lt.s32.totalorder %s1132_s30, %s1132_s30 }
  0x11   :  { %p1139_p8 = por %p1138_p7, %p1137_p6 }
  0x13   :  { %p1140_p9 = pnand %p1139_p8, %p1133_p5 }
  0x15   :  { %1143 = shalt.err (!%p1140_p9)
}
  0x16   :  { %27 = dma.hbm_to_vmem [thread:$0]  %s1320_s1, 4096, %s22_s24, [#allocation3], %s1192_s26, %s1192_s26, %s1193_s27  }
  0x17   :  { %s1194_s9 = smov [#allocation6]  }
  0x18   :  { %s45_s10 = sshll.u32 %s1194_s9, 4  ;;  %s46_s10 = int_to_ptr.vmem [resolvable:$true] %s45_s10 }
  0x19   :  { %s1152_s11 = scalar_lea.vmem %s46_s10, 16384  ;;  %p1157_p11 = scmp.lt.s32.totalorder %s46_s10, %s46_s10 }
  0x1a   :  { %p1153_p10 = scmp.ne.s32.totalorder %s46_s10, %s1152_s11  ;;  %p1158_p12 = scmp.lt.s32.totalorder %s1152_s11, %s1152_s11 }
  0x1c   :  { %p1159_p13 = por %p1158_p12, %p1157_p11 }
  0x1e   :  { %p1160_p0 = pnand %p1159_p13, %p1153_p10 }
  0x20   :  { %1163 = shalt.err (!%p1160_p0)
}
  0x21   :  { %s1195_s2 = smov 512   ;;  %s1196_s12 = smov 32  }
  0x22   :  { %51 = dma.hbm_to_vmem [thread:$0]  %s1322_s3, 16384, %s46_s10, [#allocation5], %s1195_s2, %s1195_s2, %s1196_s12  }
  0x23   :  { %s1197_s15 = smov [#allocation7]  }
  0x24   :  { %s57_s16 = sshll.u32 %s1197_s15, 4  ;;  %s58_s16 = int_to_ptr.vmem [resolvable:$true] %s57_s16 }
  0x25   :  { %s1172_s1 = scalar_lea.vmem %s58_s16, 8192  ;;  %p1177_p2 = scmp.lt.s32.totalorder %s58_s16, %s58_s16 }
  0x26   :  { %p1173_p1 = scmp.ne.s32.totalorder %s58_s16, %s1172_s1  ;;  %p1178_p3 = scmp.lt.s32.totalorder %s1172_s1, %s1172_s1 }
  0x28   :  { %p1179_p4 = por %p1178_p3, %p1177_p2 }
  0x2a   :  { %p1180_p5 = pnand %p1179_p4, %p1173_p1 }
  0x2c   :  { %1183 = shalt.err (!%p1180_p5)
}
  0x2d   :  { %s1198_s17 = smov 128   ;;  %s1199_s18 = smov 8  }
  0x2e   :  { %63 = dma.hbm_to_vmem [thread:$0]  %s1323_s4, 8192, %s58_s16, [#allocation8], %s1198_s17, %s1198_s17, %s1199_s18  }
  0x2f   :  { %1184 = dma.done.wait [#allocation3], 4096  }
  0x30   :  { %1185 = vsyncadd [#allocation3], 4294963200 }
  0x31   :  { %1186 = dma.done.wait [#allocation5], 20480  }
  0x32   :  { %1187 = vsyncadd [#allocation5], 4294946816 }
  0x33   :  { %1188 = dma.done.wait [#allocation8], 8192  }
  0x34   :  { %1189 = vsyncadd [#allocation8], 4294959104  ;;  %v1200_v0 = vmov 0.0   ;;  %vm1201_vm0 = vmmov 0   ;;  %v94_v1 = vld [vmem:[#allocation2 + $0xf0] sm:$0xff]  ;;  %v93_v2 = vld [vmem:[#allocation2 + $0xe0] sm:$0xff] }
  0x35   :  { %1022 = vmatprep.subr.mxu0 %v1200_v0  ;;  %1054 = vmatprep.mubr.msk.f32.mxu0 %vm1201_vm0, %v1200_v0  ;;  %v92_v3 = vld [vmem:[#allocation2 + $0xd0] sm:$0xff]  ;;  %v91_v4 = vld [vmem:[#allocation2 + $0xc0] sm:$0xff]  ;;  %v190_v5 = vld [vmem:[#allocation2 + $0xf8] sm:$0xff] }
  0x36   :  { %1057 = vmatprep.subr.mxu1 %v1200_v0  ;;  %1089 = vmatprep.mubr.msk.f32.mxu1 %vm1201_vm0, %v1200_v0  ;;  %v90_v6 = vld [vmem:[#allocation2 + $0xb0] sm:$0xff]  ;;  %v189_v7 = vld [vmem:[#allocation2 + $0xe8] sm:$0xff]  ;;  %v188_v8 = vld [vmem:[#allocation2 + $0xd8] sm:$0xff] }
  0x37   :  { %1023 = vmatpush3.msra.mxu0 %v94_v1  ;;  %1058 = vmatpush3.msra.mxu1 %v190_v5  ;;  %v89_v9 = vld [vmem:[#allocation2 + $0xa0] sm:$0xff]  ;;  %v187_v10 = vld [vmem:[#allocation2 + $0xc8] sm:$0xff]  ;;  %v88_v11 = vld [vmem:[#allocation2 + $0x90] sm:$0xff] }
  0x38   :  { %1024 = vmatprep.subr.mxu0 %v1200_v0  ;;  %1059 = vmatprep.subr.mxu1 %v1200_v0  ;;  %v186_v12 = vld [vmem:[#allocation2 + $0xb8] sm:$0xff]  ;;  %v87_v13 = vld [vmem:[#allocation2 + $0x80] sm:$0xff]  ;;  %v185_v14 = vld [vmem:[#allocation2 + $0xa8] sm:$0xff] }
  0x39   :  { %1025 = vmatpush3.msra.mxu0 %v93_v2  ;;  %1060 = vmatpush3.msra.mxu1 %v189_v7  ;;  %v86_v15 = vld [vmem:[#allocation2 + $0x70] sm:$0xff]  ;;  %v184_v16 = vld [vmem:[#allocation2 + $0x98] sm:$0xff]  ;;  %v85_v17 = vld [vmem:[#allocation2 + $0x60] sm:$0xff] }
  0x3a   :  { %1026 = vmatprep.subr.mxu0 %v1200_v0  ;;  %1061 = vmatprep.subr.mxu1 %v1200_v0  ;;  %v183_v18 = vld [vmem:[#allocation2 + $0x88] sm:$0xff]  ;;  %v84_v19 = vld [vmem:[#allocation2 + $0x50] sm:$0xff]  ;;  %v182_v20 = vld [vmem:[#allocation2 + $0x78] sm:$0xff] }
  0x3b   :  { %1027 = vmatpush3.msra.mxu0 %v92_v3  ;;  %1062 = vmatpush3.msra.mxu1 %v188_v8  ;;  %v83_v21 = vld [vmem:[#allocation2 + $0x40] sm:$0xff]  ;;  %v181_v22 = vld [vmem:[#allocation2 + $0x68] sm:$0xff]  ;;  %v82_v23 = vld [vmem:[#allocation2 + $0x30] sm:$0xff] }
  0x3c   :  { %1028 = vmatprep.subr.mxu0 %v1200_v0  ;;  %1063 = vmatprep.subr.mxu1 %v1200_v0  ;;  %v180_v24 = vld [vmem:[#allocation2 + $0x58] sm:$0xff]  ;;  %v81_v25 = vld [vmem:[#allocation2 + $0x20] sm:$0xff]  ;;  %v179_v26 = vld [vmem:[#allocation2 + $0x48] sm:$0xff] }
  0x3d   :  { %1029 = vmatpush3.msra.mxu0 %v91_v4  ;;  %1064 = vmatpush3.msra.mxu1 %v187_v10  ;;  %v80_v27 = vld [vmem:[#allocation2 + $0x10] sm:$0xff]  ;;  %v178_v28 = vld [vmem:[#allocation2 + $0x38] sm:$0xff]  ;;  %v79_v29 = vld [vmem:[#allocation2] sm:$0xff] }
  0x3e   :  { %1030 = vmatprep.subr.mxu0 %v1200_v0  ;;  %1065 = vmatprep.subr.mxu1 %v1200_v0  ;;  %v78_v30 = vld [vmem:[%s1319_s0] sm:$0xff]  ;;  %v177_v31 = vld [vmem:[#allocation2 + $0x28] sm:$0xff]  ;;  %v176_v32 = vld [vmem:[#allocation2 + $0x18] sm:$0xff] }
  0x3f   :  { %1031 = vmatpush3.msra.mxu0 %v90_v6  ;;  %1066 = vmatpush3.msra.mxu1 %v186_v12  ;;  %v175_v33 = vld [vmem:[#allocation2 + $0x8] sm:$0xff]  ;;  %v302_v34 = vld [vmem:[#allocation4 + $0xf8] sm:$0xff]  ;;  %v301_v35 = vld [vmem:[#allocation4 + $0xf0] sm:$0xff] }
  0x40   :  { %1032 = vmatprep.subr.mxu0 %v1200_v0  ;;  %1067 = vmatprep.subr.mxu1 %v1200_v0  ;;  %v300_v36 = vld [vmem:[#allocation4 + $0xe8] sm:$0xff]  ;;  %v299_v37 = vld [vmem:[#allocation4 + $0xe0] sm:$0xff]  ;;  %v298_v38 = vld [vmem:[#allocation4 + $0xd8] sm:$0xff] }
  0x41   :  { %1033 = vmatpush3.msra.mxu0 %v89_v9  ;;  %1068 = vmatpush3.msra.mxu1 %v185_v14  ;;  %v297_v39 = vld [vmem:[#allocation4 + $0xd0] sm:$0xff]  ;;  %v296_v40 = vld [vmem:[#allocation4 + $0xc8] sm:$0xff]  ;;  %v295_v41 = vld [vmem:[#allocation4 + $0xc0] sm:$0xff] }
  0x42   :  { %1034 = vmatprep.subr.mxu0 %v1200_v0  ;;  %1069 = vmatprep.subr.mxu1 %v1200_v0  ;;  %v294_v42 = vld [vmem:[#allocation4 + $0xb8] sm:$0xff]  ;;  %v293_v43 = vld [vmem:[#allocation4 + $0xb0] sm:$0xff]  ;;  %v292_v44 = vld [vmem:[#allocation4 + $0xa8] sm:$0xff] }
  0x43   :  { %1035 = vmatpush3.msra.mxu0 %v88_v11  ;;  %1070 = vmatpush3.msra.mxu1 %v184_v16  ;;  %v291_v45 = vld [vmem:[#allocation4 + $0xa0] sm:$0xff]  ;;  %v290_v46 = vld [vmem:[#allocation4 + $0x98] sm:$0xff]  ;;  %v289_v47 = vld [vmem:[#allocation4 + $0x90] sm:$0xff] }
  0x44   :  { %1036 = vmatprep.subr.mxu0 %v1200_v0  ;;  %1071 = vmatprep.subr.mxu1 %v1200_v0  ;;  %v288_v48 = vld [vmem:[#allocation4 + $0x88] sm:$0xff]  ;;  %v287_v49 = vld [vmem:[#allocation4 + $0x80] sm:$0xff]  ;;  %v286_v50 = vld [vmem:[#allocation4 + $0x78] sm:$0xff] }
  0x45   :  { %1037 = vmatpush3.msra.mxu0 %v87_v13  ;;  %1072 = vmatpush3.msra.mxu1 %v183_v18  ;;  %v285_v51 = vld [vmem:[#allocation4 + $0x70] sm:$0xff]  ;;  %v284_v52 = vld [vmem:[#allocation4 + $0x68] sm:$0xff]  ;;  %v283_v53 = vld [vmem:[#allocation4 + $0x60] sm:$0xff] }
  0x46   :  { %1038 = vmatprep.subr.mxu0 %v1200_v0  ;;  %1073 = vmatprep.subr.mxu1 %v1200_v0  ;;  %v282_v54 = vld [vmem:[#allocation4 + $0x58] sm:$0xff]  ;;  %v281_v55 = vld [vmem:[#allocation4 + $0x50] sm:$0xff]  ;;  %v280_v56 = vld [vmem:[#allocation4 + $0x48] sm:$0xff] }
  0x47   :  { %1039 = vmatpush3.msra.mxu0 %v86_v15  ;;  %1074 = vmatpush3.msra.mxu1 %v182_v20  ;;  %v279_v57 = vld [vmem:[#allocation4 + $0x40] sm:$0xff]  ;;  %v278_v58 = vld [vmem:[#allocation4 + $0x38] sm:$0xff]  ;;  %v277_v59 = vld [vmem:[#allocation4 + $0x30] sm:$0xff] }
  0x48   :  { %1040 = vmatprep.subr.mxu0 %v1200_v0  ;;  %1075 = vmatprep.subr.mxu1 %v1200_v0  ;;  %v915_v60 = vld [vmem:[%s1324_s5] ss:$0 sm:$0xff]  ;;  %v276_v2 = vld [vmem:[#allocation4 + $0x28] sm:$0xff]  ;;  %v274_v4 = vld [vmem:[#allocation4 + $0x18] sm:$0xff] }
  0x49   :  { %1041 = vmatpush3.msra.mxu0 %v85_v17  ;;  %1076 = vmatpush3.msra.mxu1 %v181_v22  ;;  %v275_v3 = vld [vmem:[#allocation4 + $0x20] sm:$0xff]  ;;  %v273_v5 = vld [vmem:[#allocation4 + $0x10] sm:$0xff]  ;;  %v272_v6 = vld [vmem:[#allocation4 + $0x8] sm:$0xff] }
  0x4a   :  { %1042 = vmatprep.subr.mxu0 %v1200_v0  ;;  %1077 = vmatprep.subr.mxu1 %v1200_v0  ;;  %v271_v7 = vld [vmem:[#allocation4] sm:$0xff]  ;;  %v453_v8 = vld [vmem:[#allocation6 + $0x1e8] sm:$0xff]  ;;  %v455_v9 = vld [vmem:[#allocation6 + $0x1f8] sm:$0xff] }
  0x4b   :  { %1043 = vmatpush3.msra.mxu0 %v84_v19  ;;  %1078 = vmatpush3.msra.mxu1 %v180_v24  ;;  %v452_v10 = vld [vmem:[#allocation6 + $0x1e0] sm:$0xff]  ;;  %v449_v11 = vld [vmem:[#allocation6 + $0x1c8] sm:$0xff] }
  0x4c   :  { %1044 = vmatprep.subr.mxu0 %v1200_v0  ;;  %1079 = vmatprep.subr.mxu1 %v1200_v0  ;;  %v448_v12 = vld [vmem:[#allocation6 + $0x1c0] sm:$0xff]  ;;  %v445_v13 = vld [vmem:[#allocation6 + $0x1a8] sm:$0xff] }
  0x4d   :  { %1045 = vmatpush3.msra.mxu0 %v83_v21  ;;  %1080 = vmatpush3.msra.mxu1 %v179_v26  ;;  %v444_v14 = vld [vmem:[#allocation6 + $0x1a0] sm:$0xff]  ;;  %v441_v15 = vld [vmem:[#allocation6 + $0x188] sm:$0xff] }
  0x4e   :  { %1046 = vmatprep.subr.mxu0 %v1200_v0  ;;  %1081 = vmatprep.subr.mxu1 %v1200_v0  ;;  %v440_v16 = vld [vmem:[#allocation6 + $0x180] sm:$0xff]  ;;  %v437_v17 = vld [vmem:[#allocation6 + $0x168] sm:$0xff] }
  0x4f   :  { %1047 = vmatpush3.msra.mxu0 %v82_v23  ;;  %1082 = vmatpush3.msra.mxu1 %v178_v28  ;;  %v436_v18 = vld [vmem:[#allocation6 + $0x160] sm:$0xff]  ;;  %v433_v19 = vld [vmem:[#allocation6 + $0x148] sm:$0xff] }
  0x50   :  { %1048 = vmatprep.subr.mxu0 %v1200_v0  ;;  %1083 = vmatprep.subr.mxu1 %v1200_v0  ;;  %v432_v20 = vld [vmem:[#allocation6 + $0x140] sm:$0xff]  ;;  %v429_v21 = vld [vmem:[#allocation6 + $0x128] sm:$0xff] }
  0x51   :  { %1049 = vmatpush3.msra.mxu0 %v81_v25  ;;  %1084 = vmatpush3.msra.mxu1 %v177_v31  ;;  %v428_v22 = vld [vmem:[#allocation6 + $0x120] sm:$0xff]  ;;  %v425_v23 = vld [vmem:[#allocation6 + $0x108] sm:$0xff] }
  0x52   :  { %1050 = vmatprep.subr.mxu0 %v1200_v0  ;;  %1085 = vmatprep.subr.mxu1 %v1200_v0  ;;  %v424_v24 = vld [vmem:[#allocation6 + $0x100] sm:$0xff]  ;;  %v421_v25 = vld [vmem:[#allocation6 + $0xe8] sm:$0xff] }
  0x53   :  { %1051 = vmatpush3.msra.mxu0 %v80_v27  ;;  %1086 = vmatpush3.msra.mxu1 %v176_v32  ;;  %v420_v26 = vld [vmem:[#allocation6 + $0xe0] sm:$0xff]  ;;  %v417_v27 = vld [vmem:[#allocation6 + $0xc8] sm:$0xff] }
  0x54   :  { %1052 = vmatprep.subr.mxu0 %v1200_v0  ;;  %1087 = vmatprep.subr.mxu1 %v1200_v0  ;;  %v416_v28 = vld [vmem:[#allocation6 + $0xc0] sm:$0xff]  ;;  %v409_v31 = vld [vmem:[#allocation6 + $0x88] sm:$0xff] }
  0x55   :  { %1053 = vmatpush3.msra.mxu0 %v79_v29  ;;  %1088 = vmatpush3.msra.mxu1 %v175_v33  ;;  %v413_v29 = vld [vmem:[#allocation6 + $0xa8] sm:$0xff]  ;;  %v408_v32 = vld [vmem:[#allocation6 + $0x80] sm:$0xff] }
  0x56   :  { %1055 = vmatmul.mubr.f32.vlgmr.msra.gmra.mxu0 %v78_v30  ;;  %315 = vmatprep.subr.mxu0 %v302_v34  ;;  %v412_v30 = vld [vmem:[#allocation6 + $0xa0] sm:$0xff]  ;;  %v405_v33 = vld [vmem:[#allocation6 + $0x68] sm:$0xff] }
  0x57   :  { %379 = vmatprep.mubr.f32.mxu0 %v1200_v0  ;;  %316 = vmatpush1.msra.mxu0 %v301_v35  ;;  %v404_v34 = vld [vmem:[#allocation6 + $0x60] sm:$0xff]  ;;  %v401_v35 = vld [vmem:[#allocation6 + $0x48] sm:$0xff] }
  0x58   :  { %317 = vmatprep.subr.mxu0 %v300_v36  ;;  %542 = vmatprep.subr.mxu1 %v453_v8  ;;  %v400_v36 = vld [vmem:[#allocation6 + $0x40] sm:$0xff]  ;;  %v450_v8 = vld [vmem:[#allocation6 + $0x1d0] sm:$0xff] }
  0x59   :  { %318 = vmatpush1.msra.mxu0 %v299_v37  ;;  %v397_v37 = vld [vmem:[#allocation6 + $0x28] sm:$0xff] }
  0x5a   :  { %319 = vmatprep.subr.mxu0 %v298_v38  ;;  %v396_v38 = vld [vmem:[#allocation6 + $0x20] sm:$0xff] }
  0x5b   :  { %320 = vmatpush1.msra.mxu0 %v297_v39  ;;  %v393_v39 = vld [vmem:[#allocation6 + $0x8] sm:$0xff] }
  0x5c   :  { %321 = vmatprep.subr.mxu0 %v296_v40  ;;  %v392_v40 = vld [vmem:[#allocation6] sm:$0xff] }
  0x5d   :  { %322 = vmatpush1.msra.mxu0 %v295_v41  ;;  %v517_v41 = vld [vmem:[#allocation6 + $0x3e8] sm:$0xff] }
  0x5e   :  { %323 = vmatprep.subr.mxu0 %v294_v42  ;;  %v516_v42 = vld [vmem:[#allocation6 + $0x3e0] sm:$0xff] }
  0x5f   :  { %324 = vmatpush1.msra.mxu0 %v293_v43  ;;  %v513_v43 = vld [vmem:[#allocation6 + $0x3c8] sm:$0xff] }
  0x60   :  { %325 = vmatprep.subr.mxu0 %v292_v44  ;;  %v512_v44 = vld [vmem:[#allocation6 + $0x3c0] sm:$0xff] }
  0x61   :  { %326 = vmatpush1.msra.mxu0 %v291_v45  ;;  %v509_v45 = vld [vmem:[#allocation6 + $0x3a8] sm:$0xff] }
  0x62   :  { %327 = vmatprep.subr.mxu0 %v290_v46  ;;  %v508_v46 = vld [vmem:[#allocation6 + $0x3a0] sm:$0xff] }
  0x63   :  { %328 = vmatpush1.msra.mxu0 %v289_v47  ;;  %v505_v47 = vld [vmem:[#allocation6 + $0x388] sm:$0xff] }
  0x64   :  { %329 = vmatprep.subr.mxu0 %v288_v48  ;;  %v504_v48 = vld [vmem:[#allocation6 + $0x380] sm:$0xff] }
  0x65   :  { %330 = vmatpush1.msra.mxu0 %v287_v49  ;;  %v501_v49 = vld [vmem:[#allocation6 + $0x368] sm:$0xff] }
  0x66   :  { %331 = vmatprep.subr.mxu0 %v286_v50  ;;  %v500_v50 = vld [vmem:[#allocation6 + $0x360] sm:$0xff] }
  0x67   :  { %332 = vmatpush1.msra.mxu0 %v285_v51  ;;  %v497_v51 = vld [vmem:[#allocation6 + $0x348] sm:$0xff] }
  0x68   :  { %333 = vmatprep.subr.mxu0 %v284_v52  ;;  %v496_v52 = vld [vmem:[#allocation6 + $0x340] sm:$0xff] }
  0x69   :  { %334 = vmatpush1.msra.mxu0 %v283_v53  ;;  %v493_v53 = vld [vmem:[#allocation6 + $0x328] sm:$0xff] }
  0x6a   :  { %335 = vmatprep.subr.mxu0 %v282_v54  ;;  %v492_v54 = vld [vmem:[#allocation6 + $0x320] sm:$0xff] }
  0x6b   :  { %336 = vmatpush1.msra.mxu0 %v281_v55  ;;  %v489_v55 = vld [vmem:[#allocation6 + $0x308] sm:$0xff] }
  0x6c   :  { %337 = vmatprep.subr.mxu0 %v280_v56  ;;  %v488_v56 = vld [vmem:[#allocation6 + $0x300] sm:$0xff] }
  0x6d   :  { %338 = vmatpush1.msra.mxu0 %v279_v57  ;;  %v485_v57 = vld [vmem:[#allocation6 + $0x2e8] sm:$0xff] }
  0x6e   :  { %339 = vmatprep.subr.mxu0 %v278_v58  ;;  %v484_v58 = vld [vmem:[#allocation6 + $0x2e0] sm:$0xff] }
  0x6f   :  { %340 = vmatpush1.msra.mxu0 %v277_v59  ;;  %v481_v59 = vld [vmem:[#allocation6 + $0x2c8] sm:$0xff] }
  0x70   :  { %341 = vmatprep.subr.mxu0 %v276_v2 }
  0x71   :  { %342 = vmatpush1.msra.mxu0 %v275_v3 }
  0x72   :  { %343 = vmatprep.subr.mxu0 %v274_v4 }
  0x73   :  { %344 = vmatpush1.msra.mxu0 %v273_v5  ;;  %v454_v5 = vld [vmem:[#allocation6 + $0x1f0] sm:$0xff] }
  0x74   :  { %345 = vmatprep.subr.mxu0 %v272_v6 }
  0x75   :  { %346 = vmatpush1.msra.mxu0 %v271_v7  ;;  %v451_v7 = vld [vmem:[#allocation6 + $0x1d8] sm:$0xff] }
  0x76   :  { %613 = vmatprep.subr.mxu0 %v455_v9  ;;  %v447_v9 = vld [vmem:[#allocation6 + $0x1b8] sm:$0xff] }
 0x116   :  { %v168_v61 = vpop.f32.mrf.mxu0 }
 0x117   :  { %v169_v62 = vadd.f32 %v915_v60, %v168_v61  ;;  %v480_v60 = vld [vmem:[#allocation6 + $0x2c0] sm:$0xff]  ;;  %v477_v61 = vld [vmem:[#allocation6 + $0x2a8] sm:$0xff] }
 0x118   :  { %v1056_v63 = vpop.f32.mrf.mxu0 }
 0x119   :  { %v173_v0 = vmul.f32 0.2, %v169_v62  ;;  %vm172_vm1 = vcmp.ge.f32.partialorder %v169_v62, 0.0  ;;  %v473_v63 = vld [vmem:[#allocation6 + $0x288] sm:$0xff] }
 0x11b   :  { %v174_v1 = vsel %vm172_vm1, %v169_v62, %v173_v0  ;;  %v476_v62 = vld [vmem:[#allocation6 + $0x2a0] sm:$0xff] }
 0x11c   :  { %1090 = vmatmul.mubr.f32.vlgmr.msra.gmra.mxu1 %v174_v1  ;;  %v916_v0 = vld [vmem:[%s1324_s5 + $0x1] ss:$0 sm:$0xff] }
 0x11d   :  { %543 = vmatpush1.msra.mxu1 %v452_v10  ;;  %v446_v10 = vld [vmem:[#allocation6 + $0x1b0] sm:$0xff] }
 0x11e   :  { %544 = vmatprep.subr.mxu1 %v449_v11  ;;  %v443_v11 = vld [vmem:[#allocation6 + $0x198] sm:$0xff] }
 0x11f   :  { %545 = vmatpush1.msra.mxu1 %v448_v12  ;;  %v442_v12 = vld [vmem:[#allocation6 + $0x190] sm:$0xff] }
 0x120   :  { %546 = vmatprep.subr.mxu1 %v445_v13  ;;  %v439_v13 = vld [vmem:[#allocation6 + $0x178] sm:$0xff] }
 0x121   :  { %547 = vmatpush1.msra.mxu1 %v444_v14  ;;  %v438_v14 = vld [vmem:[#allocation6 + $0x170] sm:$0xff] }
 0x122   :  { %548 = vmatprep.subr.mxu1 %v441_v15  ;;  %v435_v15 = vld [vmem:[#allocation6 + $0x158] sm:$0xff] }
 0x123   :  { %549 = vmatpush1.msra.mxu1 %v440_v16  ;;  %v434_v16 = vld [vmem:[#allocation6 + $0x150] sm:$0xff] }
 0x124   :  { %550 = vmatprep.subr.mxu1 %v437_v17  ;;  %v431_v17 = vld [vmem:[#allocation6 + $0x138] sm:$0xff] }
 0x125   :  { %551 = vmatpush1.msra.mxu1 %v436_v18  ;;  %v430_v18 = vld [vmem:[#allocation6 + $0x130] sm:$0xff] }
 0x126   :  { %552 = vmatprep.subr.mxu1 %v433_v19  ;;  %v427_v19 = vld [vmem:[#allocation6 + $0x118] sm:$0xff] }
 0x127   :  { %553 = vmatpush1.msra.mxu1 %v432_v20  ;;  %v426_v20 = vld [vmem:[#allocation6 + $0x110] sm:$0xff] }
 0x128   :  { %554 = vmatprep.subr.mxu1 %v429_v21  ;;  %v423_v21 = vld [vmem:[#allocation6 + $0xf8] sm:$0xff] }
 0x129   :  { %555 = vmatpush1.msra.mxu1 %v428_v22  ;;  %v422_v22 = vld [vmem:[#allocation6 + $0xf0] sm:$0xff] }
 0x12a   :  { %556 = vmatprep.subr.mxu1 %v425_v23  ;;  %v419_v23 = vld [vmem:[#allocation6 + $0xd8] sm:$0xff] }
 0x12b   :  { %557 = vmatpush1.msra.mxu1 %v424_v24  ;;  %v418_v24 = vld [vmem:[#allocation6 + $0xd0] sm:$0xff] }
 0x12c   :  { %558 = vmatprep.subr.mxu1 %v421_v25  ;;  %v415_v25 = vld [vmem:[#allocation6 + $0xb8] sm:$0xff] }
 0x12d   :  { %559 = vmatpush1.msra.mxu1 %v420_v26  ;;  %v414_v26 = vld [vmem:[#allocation6 + $0xb0] sm:$0xff] }
 0x12e   :  { %560 = vmatprep.subr.mxu1 %v417_v27  ;;  %v411_v27 = vld [vmem:[#allocation6 + $0x98] sm:$0xff] }
 0x12f   :  { %561 = vmatpush1.msra.mxu1 %v416_v28  ;;  %v410_v28 = vld [vmem:[#allocation6 + $0x90] sm:$0xff] }
 0x130   :  { %562 = vmatprep.subr.mxu1 %v413_v29  ;;  %v407_v29 = vld [vmem:[#allocation6 + $0x78] sm:$0xff] }
 0x131   :  { %563 = vmatpush1.msra.mxu1 %v412_v30  ;;  %v406_v30 = vld [vmem:[#allocation6 + $0x70] sm:$0xff] }
 0x132   :  { %564 = vmatprep.subr.mxu1 %v409_v31  ;;  %v403_v31 = vld [vmem:[#allocation6 + $0x58] sm:$0xff] }
 0x133   :  { %565 = vmatpush1.msra.mxu1 %v408_v32  ;;  %v402_v32 = vld [vmem:[#allocation6 + $0x50] sm:$0xff] }
 0x134   :  { %566 = vmatprep.subr.mxu1 %v405_v33  ;;  %v399_v33 = vld [vmem:[#allocation6 + $0x38] sm:$0xff] }
 0x135   :  { %567 = vmatpush1.msra.mxu1 %v404_v34  ;;  %v398_v34 = vld [vmem:[#allocation6 + $0x30] sm:$0xff] }
 0x136   :  { %568 = vmatprep.subr.mxu1 %v401_v35  ;;  %v395_v35 = vld [vmem:[#allocation6 + $0x18] sm:$0xff] }
 0x137   :  { %569 = vmatpush1.msra.mxu1 %v400_v36  ;;  %v394_v36 = vld [vmem:[#allocation6 + $0x10] sm:$0xff] }
 0x138   :  { %570 = vmatprep.subr.mxu1 %v397_v37  ;;  %v519_v37 = vld [vmem:[#allocation6 + $0x3f8] sm:$0xff] }
 0x139   :  { %571 = vmatpush1.msra.mxu1 %v396_v38  ;;  %v518_v38 = vld [vmem:[#allocation6 + $0x3f0] sm:$0xff] }
 0x13a   :  { %572 = vmatprep.subr.mxu1 %v393_v39  ;;  %v515_v39 = vld [vmem:[#allocation6 + $0x3d8] sm:$0xff] }
 0x13b   :  { %573 = vmatpush1.msra.mxu1 %v392_v40  ;;  %v514_v40 = vld [vmem:[#allocation6 + $0x3d0] sm:$0xff] }
 0x13c   :  { %574 = vmatprep.subr.mxu1 %v517_v41  ;;  %v511_v41 = vld [vmem:[#allocation6 + $0x3b8] sm:$0xff] }
 0x13d   :  { %575 = vmatpush2.msra.mxu1 %v516_v42  ;;  %v510_v42 = vld [vmem:[#allocation6 + $0x3b0] sm:$0xff] }
 0x13e   :  { %576 = vmatprep.subr.mxu1 %v513_v43  ;;  %v507_v43 = vld [vmem:[#allocation6 + $0x398] sm:$0xff] }
 0x13f   :  { %577 = vmatpush2.msra.mxu1 %v512_v44  ;;  %v506_v44 = vld [vmem:[#allocation6 + $0x390] sm:$0xff] }
 0x140   :  { %578 = vmatprep.subr.mxu1 %v509_v45  ;;  %v503_v45 = vld [vmem:[#allocation6 + $0x378] sm:$0xff] }
 0x141   :  { %579 = vmatpush2.msra.mxu1 %v508_v46  ;;  %v502_v46 = vld [vmem:[#allocation6 + $0x370] sm:$0xff] }
 0x142   :  { %580 = vmatprep.subr.mxu1 %v505_v47  ;;  %v499_v47 = vld [vmem:[#allocation6 + $0x358] sm:$0xff] }
 0x143   :  { %581 = vmatpush2.msra.mxu1 %v504_v48  ;;  %v498_v48 = vld [vmem:[#allocation6 + $0x350] sm:$0xff] }
 0x144   :  { %582 = vmatprep.subr.mxu1 %v501_v49  ;;  %v495_v49 = vld [vmem:[#allocation6 + $0x338] sm:$0xff] }
 0x145   :  { %583 = vmatpush2.msra.mxu1 %v500_v50  ;;  %v494_v50 = vld [vmem:[#allocation6 + $0x330] sm:$0xff] }
 0x146   :  { %584 = vmatprep.subr.mxu1 %v497_v51  ;;  %v491_v51 = vld [vmem:[#allocation6 + $0x318] sm:$0xff] }
 0x147   :  { %585 = vmatpush2.msra.mxu1 %v496_v52  ;;  %v490_v52 = vld [vmem:[#allocation6 + $0x310] sm:$0xff] }
 0x148   :  { %586 = vmatprep.subr.mxu1 %v493_v53  ;;  %v487_v53 = vld [vmem:[#allocation6 + $0x2f8] sm:$0xff] }
 0x149   :  { %587 = vmatpush2.msra.mxu1 %v492_v54  ;;  %v486_v54 = vld [vmem:[#allocation6 + $0x2f0] sm:$0xff] }
 0x14a   :  { %588 = vmatprep.subr.mxu1 %v489_v55  ;;  %v483_v55 = vld [vmem:[#allocation6 + $0x2d8] sm:$0xff] }
 0x14b   :  { %589 = vmatpush2.msra.mxu1 %v488_v56  ;;  %v482_v56 = vld [vmem:[#allocation6 + $0x2d0] sm:$0xff] }
 0x14c   :  { %590 = vmatprep.subr.mxu1 %v485_v57  ;;  %v479_v57 = vld [vmem:[#allocation6 + $0x2b8] sm:$0xff] }
 0x14d   :  { %591 = vmatpush2.msra.mxu1 %v484_v58  ;;  %v478_v58 = vld [vmem:[#allocation6 + $0x2b0] sm:$0xff] }
 0x14e   :  { %592 = vmatprep.subr.mxu1 %v481_v59  ;;  %v475_v59 = vld [vmem:[#allocation6 + $0x298] sm:$0xff] }
 0x14f   :  { %593 = vmatpush2.msra.mxu1 %v480_v60  ;;  %v472_v60 = vld [vmem:[#allocation6 + $0x280] sm:$0xff] }
 0x150   :  { %594 = vmatprep.subr.mxu1 %v477_v61  ;;  %v474_v61 = vld [vmem:[#allocation6 + $0x290] sm:$0xff] }
 0x151   :  { %595 = vmatpush2.msra.mxu1 %v476_v62  ;;  %v469_v62 = vld [vmem:[#allocation6 + $0x268] sm:$0xff] }
 0x152   :  { %596 = vmatprep.subr.mxu1 %v473_v63  ;;  %v471_v63 = vld [vmem:[#allocation6 + $0x278] sm:$0xff] }
 0x153   :  { %597 = vmatpush2.msra.mxu1 %v472_v60  ;;  %v736_v60 = vld [vmem:[#allocation7 + $0x140] sm:$0xff] }
 0x154   :  { %598 = vmatprep.subr.mxu1 %v469_v62  ;;  %v751_v62 = vld [vmem:[#allocation7 + $0x1b8] sm:$0xff] }
 0x1dc   :  { %v264_v1 = vpop.f32.mrf.mxu1 }
 0x1dd   :  { %v265_v2 = vadd.f32 %v916_v0, %v264_v1  ;;  %v468_v0 = vld [vmem:[#allocation6 + $0x260] sm:$0xff]  ;;  %v470_v1 = vld [vmem:[#allocation6 + $0x270] sm:$0xff] }
 0x1de   :  { %v1091_v3 = vpop.f32.mrf.mxu1  ;;  %599 = vmatpush2.msra.mxu1 %v468_v0  ;;  %v735_v0 = vld [vmem:[#allocation7 + $0x138] sm:$0xff] }
 0x1df   :  { %vm268_vm2 = vcmp.ge.f32.partialorder %v265_v2, 0.0  ;;  %v269_v4 = vmul.f32 0.2, %v265_v2  ;;  %v467_v3 = vld [vmem:[#allocation6 + $0x258] sm:$0xff] }
 0x1e1   :  { %v270_v6 = vsel %vm268_vm2, %v265_v2, %v269_v4  ;;  %v465_v2 = vld [vmem:[#allocation6 + $0x248] sm:$0xff]  ;;  %v464_v4 = vld [vmem:[#allocation6 + $0x240] sm:$0xff] }
 0x1e2   :  { %380 = vmatmul.mubr.f32.vlgmr.msra.gmra.mxu0 %v270_v6  ;;  %600 = vmatprep.subr.mxu1 %v465_v2  ;;  %v461_v6 = vld [vmem:[#allocation6 + $0x228] sm:$0xff]  ;;  %v750_v2 = vld [vmem:[#allocation7 + $0x1b0] sm:$0xff] }
 0x1e3   :  { %614 = vmatpush1.msra.mxu0 %v454_v5  ;;  %v466_v5 = vld [vmem:[#allocation6 + $0x250] sm:$0xff]  ;;  %601 = vmatpush2.msra.mxu1 %v464_v4 }
 0x1e4   :  { %615 = vmatprep.subr.mxu0 %v451_v7  ;;  %v463_v7 = vld [vmem:[#allocation6 + $0x238] sm:$0xff]  ;;  %602 = vmatprep.subr.mxu1 %v461_v6  ;;  %v734_v4 = vld [vmem:[#allocation7 + $0x130] sm:$0xff]  ;;  %v749_v6 = vld [vmem:[#allocation7 + $0x1a8] sm:$0xff] }
 0x1e5   :  { %616 = vmatpush1.msra.mxu0 %v450_v8  ;;  %v460_v8 = vld [vmem:[#allocation6 + $0x220] sm:$0xff] }
 0x1e6   :  { %617 = vmatprep.subr.mxu0 %v447_v9  ;;  %v462_v9 = vld [vmem:[#allocation6 + $0x230] sm:$0xff]  ;;  %603 = vmatpush2.msra.mxu1 %v460_v8  ;;  %v733_v8 = vld [vmem:[#allocation7 + $0x128] sm:$0xff] }
 0x1e7   :  { %618 = vmatpush1.msra.mxu0 %v446_v10  ;;  %v457_v10 = vld [vmem:[#allocation6 + $0x208] sm:$0xff] }
 0x1e8   :  { %619 = vmatprep.subr.mxu0 %v443_v11  ;;  %v459_v11 = vld [vmem:[#allocation6 + $0x218] sm:$0xff]  ;;  %604 = vmatprep.subr.mxu1 %v457_v10  ;;  %v748_v10 = vld [vmem:[#allocation7 + $0x1a0] sm:$0xff] }
 0x1e9   :  { %620 = vmatpush1.msra.mxu0 %v442_v12  ;;  %v456_v12 = vld [vmem:[#allocation6 + $0x200] sm:$0xff] }
 0x1ea   :  { %621 = vmatprep.subr.mxu0 %v439_v13  ;;  %v458_v13 = vld [vmem:[#allocation6 + $0x210] sm:$0xff]  ;;  %605 = vmatpush2.msra.mxu1 %v456_v12  ;;  %v732_v12 = vld [vmem:[#allocation7 + $0x120] sm:$0xff] }
 0x1eb   :  { %622 = vmatpush1.msra.mxu0 %v438_v14  ;;  %v727_v14 = vld [vmem:[#allocation7 + $0xf8] sm:$0xff] }
 0x1ec   :  { %623 = vmatprep.subr.mxu0 %v435_v15  ;;  %v759_v15 = vld [vmem:[#allocation7 + $0x1f8] sm:$0xff]  ;;  %952 = vmatprep.subr.mxu1 %v727_v14 }
 0x1ed   :  { %624 = vmatpush1.msra.mxu0 %v434_v16  ;;  %v305_v16 = vlaneseq  ;;  %v747_v14 = vld [vmem:[#allocation7 + $0x198] sm:$0xff] }
 0x1ee   :  { %625 = vmatprep.subr.mxu0 %v431_v17 }
 0x1ef   :  { %626 = vmatpush1.msra.mxu0 %v430_v18  ;;  %v1293_v17 = vshrl.u32 %v305_v16, 7  ;;  %v731_v16 = vld [vmem:[#allocation7 + $0x118] sm:$0xff] }
 0x1f0   :  { %627 = vmatprep.subr.mxu0 %v427_v19  ;;  %v303_v19 = vld [vmem:[%s1324_s5 + $0x2] sm:$0x3] }
 0x1f1   :  { %628 = vmatpush1.msra.mxu0 %v426_v20  ;;  %v307_v18 = vsub.s32 0, %v1293_v17  ;;  %v311_v20 = vsub.s32 1, %v1293_v17 }
 0x1f2   :  { %629 = vmatprep.subr.mxu0 %v423_v21 }
 0x1f3   :  { %630 = vmatpush1.msra.mxu0 %v422_v22  ;;  %v308_v21 = vrot.slane %v303_v19, %v307_v18  ;;  %v312_v22 = vrot.slane %v303_v19, %v311_v20  ;;  %v714_v19 = vld [vmem:[#allocation7 + $0x90] sm:$0xff] }
 0x1f4   :  { %631 = vmatprep.subr.mxu0 %v419_v23 }
 0x1f5   :  { %632 = vmatpush1.msra.mxu0 %v418_v24 }
 0x1f6   :  { %633 = vmatprep.subr.mxu0 %v415_v25 }
 0x1f7   :  { %634 = vmatpush1.msra.mxu0 %v414_v26 }
 0x1f8   :  { %635 = vmatprep.subr.mxu0 %v411_v27 }
 0x1f9   :  { %636 = vmatpush1.msra.mxu0 %v410_v28 }
 0x1fa   :  { %637 = vmatprep.subr.mxu0 %v407_v29 }
 0x1fb   :  { %638 = vmatpush1.msra.mxu0 %v406_v30  ;;  %v711_v30 = vld [vmem:[#allocation7 + $0x78] sm:$0xff] }
 0x1fc   :  { %639 = vmatprep.subr.mxu0 %v403_v31  ;;  %v743_v31 = vld [vmem:[#allocation7 + $0x178] sm:$0xff] }
 0x1fd   :  { %640 = vmatpush1.msra.mxu0 %v402_v32 }
 0x1fe   :  { %641 = vmatprep.subr.mxu0 %v399_v33  ;;  %v726_v33 = vld [vmem:[#allocation7 + $0xf0] sm:$0xff] }
 0x1ff   :  { %642 = vmatpush1.msra.mxu0 %v398_v34  ;;  %v758_v34 = vld [vmem:[#allocation7 + $0x1f0] sm:$0xff] }
 0x200   :  { %643 = vmatprep.subr.mxu0 %v395_v35  ;;  %v710_v35 = vld [vmem:[#allocation7 + $0x70] sm:$0xff] }
 0x201   :  { %644 = vmatpush1.msra.mxu0 %v394_v36  ;;  %v742_v36 = vld [vmem:[#allocation7 + $0x170] sm:$0xff] }
 0x202   :  { %645 = vmatprep.subr.mxu0 %v519_v37  ;;  %v725_v37 = vld [vmem:[#allocation7 + $0xe8] sm:$0xff] }
 0x203   :  { %646 = vmatpush2.msra.mxu0 %v518_v38  ;;  %v757_v38 = vld [vmem:[#allocation7 + $0x1e8] sm:$0xff] }
 0x204   :  { %647 = vmatprep.subr.mxu0 %v515_v39  ;;  %v709_v39 = vld [vmem:[#allocation7 + $0x68] sm:$0xff] }
 0x205   :  { %648 = vmatpush2.msra.mxu0 %v514_v40  ;;  %v741_v40 = vld [vmem:[#allocation7 + $0x168] sm:$0xff] }
 0x206   :  { %649 = vmatprep.subr.mxu0 %v511_v41  ;;  %v724_v41 = vld [vmem:[#allocation7 + $0xe0] sm:$0xff] }
 0x207   :  { %650 = vmatpush2.msra.mxu0 %v510_v42  ;;  %v756_v42 = vld [vmem:[#allocation7 + $0x1e0] sm:$0xff] }
 0x208   :  { %651 = vmatprep.subr.mxu0 %v507_v43  ;;  %v708_v43 = vld [vmem:[#allocation7 + $0x60] sm:$0xff] }
 0x209   :  { %652 = vmatpush2.msra.mxu0 %v506_v44  ;;  %v740_v44 = vld [vmem:[#allocation7 + $0x160] sm:$0xff] }
 0x20a   :  { %653 = vmatprep.subr.mxu0 %v503_v45  ;;  %v723_v45 = vld [vmem:[#allocation7 + $0xd8] sm:$0xff] }
 0x20b   :  { %654 = vmatpush2.msra.mxu0 %v502_v46  ;;  %v755_v46 = vld [vmem:[#allocation7 + $0x1d8] sm:$0xff] }
 0x20c   :  { %655 = vmatprep.subr.mxu0 %v499_v47  ;;  %v707_v47 = vld [vmem:[#allocation7 + $0x58] sm:$0xff] }
 0x20d   :  { %656 = vmatpush2.msra.mxu0 %v498_v48  ;;  %v739_v48 = vld [vmem:[#allocation7 + $0x158] sm:$0xff] }
 0x20e   :  { %657 = vmatprep.subr.mxu0 %v495_v49  ;;  %v722_v49 = vld [vmem:[#allocation7 + $0xd0] sm:$0xff] }
 0x20f   :  { %658 = vmatpush2.msra.mxu0 %v494_v50  ;;  %v754_v50 = vld [vmem:[#allocation7 + $0x1d0] sm:$0xff] }
 0x210   :  { %659 = vmatprep.subr.mxu0 %v491_v51  ;;  %v706_v51 = vld [vmem:[#allocation7 + $0x50] sm:$0xff] }
 0x211   :  { %660 = vmatpush2.msra.mxu0 %v490_v52  ;;  %v738_v52 = vld [vmem:[#allocation7 + $0x150] sm:$0xff] }
 0x212   :  { %661 = vmatprep.subr.mxu0 %v487_v53  ;;  %v721_v53 = vld [vmem:[#allocation7 + $0xc8] sm:$0xff] }
 0x213   :  { %662 = vmatpush2.msra.mxu0 %v486_v54  ;;  %v753_v54 = vld [vmem:[#allocation7 + $0x1c8] sm:$0xff] }
 0x214   :  { %663 = vmatprep.subr.mxu0 %v483_v55  ;;  %v705_v55 = vld [vmem:[#allocation7 + $0x48] sm:$0xff] }
 0x215   :  { %664 = vmatpush2.msra.mxu0 %v482_v56  ;;  %v737_v56 = vld [vmem:[#allocation7 + $0x148] sm:$0xff] }
 0x216   :  { %665 = vmatprep.subr.mxu0 %v479_v57  ;;  %v720_v57 = vld [vmem:[#allocation7 + $0xc0] sm:$0xff] }
 0x217   :  { %666 = vmatpush2.msra.mxu0 %v478_v58  ;;  %v752_v58 = vld [vmem:[#allocation7 + $0x1c0] sm:$0xff] }
 0x218   :  { %667 = vmatprep.subr.mxu0 %v475_v59  ;;  %v704_v59 = vld [vmem:[#allocation7 + $0x40] sm:$0xff] }
 0x219   :  { %668 = vmatpush2.msra.mxu0 %v474_v61  ;;  %v719_v61 = vld [vmem:[#allocation7 + $0xb8] sm:$0xff] }
 0x21a   :  { %669 = vmatprep.subr.mxu0 %v471_v63  ;;  %v703_v63 = vld [vmem:[#allocation7 + $0x38] sm:$0xff] }
 0x21b   :  { %670 = vmatpush2.msra.mxu0 %v470_v1  ;;  %v718_v1 = vld [vmem:[#allocation7 + $0xb0] sm:$0xff] }
 0x21c   :  { %671 = vmatprep.subr.mxu0 %v467_v3  ;;  %v702_v3 = vld [vmem:[#allocation7 + $0x30] sm:$0xff] }
 0x21d   :  { %672 = vmatpush2.msra.mxu0 %v466_v5  ;;  %v717_v5 = vld [vmem:[#allocation7 + $0xa8] sm:$0xff] }
 0x21e   :  { %673 = vmatprep.subr.mxu0 %v463_v7  ;;  %v701_v7 = vld [vmem:[#allocation7 + $0x28] sm:$0xff] }
 0x21f   :  { %674 = vmatpush2.msra.mxu0 %v462_v9  ;;  %v716_v9 = vld [vmem:[#allocation7 + $0xa0] sm:$0xff] }
 0x220   :  { %675 = vmatprep.subr.mxu0 %v459_v11  ;;  %v700_v11 = vld [vmem:[#allocation7 + $0x20] sm:$0xff] }
 0x221   :  { %676 = vmatpush2.msra.mxu0 %v458_v13  ;;  %v715_v13 = vld [vmem:[#allocation7 + $0x98] sm:$0xff] }
 0x222   :  { %987 = vmatprep.subr.mxu0 %v759_v15  ;;  %v699_v15 = vld [vmem:[#allocation7 + $0x18] sm:$0xff] }
 0x2a2   :  { %v381_v23 = vpop.f32.mrf.mxu0 }
 0x2a3   :  { %v382_v24 = vadd.f32 %v381_v23, %v308_v21  ;;  %v746_v21 = vld [vmem:[#allocation7 + $0x190] sm:$0xff] }
 0x2a4   :  { %v383_v25 = vpop.f32.mrf.mxu0  ;;  %v730_v23 = vld [vmem:[#allocation7 + $0x110] sm:$0xff] }
 0x2a5   :  { %v384_v26 = vadd.f32 %v383_v25, %v312_v22  ;;  %v388_v27 = vmul.f32 0.2, %v382_v24  ;;  %vm386_vm3 = vcmp.ge.f32.partialorder %v382_v24, 0.0  ;;  %v698_v22 = vld [vmem:[#allocation7 + $0x10] sm:$0xff]  ;;  %v745_v25 = vld [vmem:[#allocation7 + $0x188] sm:$0xff] }
 0x2a7   :  { %v389_v28 = vmul.f32 0.2, %v384_v26  ;;  %vm387_vm4 = vcmp.ge.f32.partialorder %v384_v26, 0.0  ;;  %v390_v32 = vsel %vm386_vm3, %v382_v24, %v388_v27  ;;  %v713_v24 = vld [vmem:[#allocation7 + $0x88] sm:$0xff] }
 0x2a8   :  { %v729_v27 = vld [vmem:[#allocation7 + $0x108] sm:$0xff] }
 0x2a9   :  { %v391_v29 = vsel %vm387_vm4, %v384_v26, %v389_v28  ;;  %v697_v26 = vld [vmem:[#allocation7 + $0x8] sm:$0xff]  ;;  %v712_v28 = vld [vmem:[#allocation7 + $0x80] sm:$0xff] }
 0x2aa   :  { %606 = vmatprep.mubr.f32.mxu1 %v391_v29  ;;  %677 = vmatprep.mubr.f32.mxu0 %v391_v29  ;;  %v744_v29 = vld [vmem:[#allocation7 + $0x180] sm:$0xff] }
 0x2ab   :  { %607 = vmatmul.mubr.f32.vlgmr.msra.gmra.mxu1 %v390_v32  ;;  %678 = vmatmul.mubr.f32.vlgmr.msra.gmra.mxu0 %v390_v32  ;;  %v532_v32 = vsub.s32 2, %v1293_v17 }
 0x2ac   :  { %953 = vmatpush3.msra.mxu1 %v711_v30  ;;  %988 = vmatpush3.msra.mxu0 %v743_v31  ;;  %v696_v30 = vld [vmem:[#allocation7] sm:$0xff] }
 0x2ad   :  { %954 = vmatprep.subr.mxu1 %v726_v33  ;;  %989 = vmatprep.subr.mxu0 %v758_v34  ;;  %v728_v31 = vld [vmem:[#allocation7 + $0x100] sm:$0xff]  ;;  %v536_v34 = vsub.s32 3, %v1293_v17 }
 0x2ae   :  { %955 = vmatpush3.msra.mxu1 %v710_v35  ;;  %990 = vmatpush3.msra.mxu0 %v742_v36  ;;  %v520_v33 = vld [vmem:[%s1324_s5 + $0x4] sm:$0xf] }
 0x2af   :  { %956 = vmatprep.subr.mxu1 %v725_v37  ;;  %991 = vmatprep.subr.mxu0 %v757_v38  ;;  %v525_v35 = vrot.slane %v520_v33, %v307_v18  ;;  %v533_v36 = vrot.slane %v520_v33, %v532_v32 }
 0x2b0   :  { %957 = vmatpush3.msra.mxu1 %v709_v39  ;;  %992 = vmatpush3.msra.mxu0 %v741_v40  ;;  %v529_v39 = vrot.slane %v520_v33, %v311_v20  ;;  %v537_v40 = vrot.slane %v520_v33, %v536_v34 }
 0x2b1   :  { %958 = vmatprep.subr.mxu1 %v724_v41  ;;  %993 = vmatprep.subr.mxu0 %v756_v42 }
 0x2b2   :  { %959 = vmatpush3.msra.mxu1 %v708_v43  ;;  %994 = vmatpush3.msra.mxu0 %v740_v44 }
 0x2b3   :  { %960 = vmatprep.subr.mxu1 %v723_v45  ;;  %995 = vmatprep.subr.mxu0 %v755_v46 }
 0x2b4   :  { %961 = vmatpush3.msra.mxu1 %v707_v47  ;;  %996 = vmatpush3.msra.mxu0 %v739_v48 }
 0x2b5   :  { %962 = vmatprep.subr.mxu1 %v722_v49  ;;  %997 = vmatprep.subr.mxu0 %v754_v50 }
 0x2b6   :  { %963 = vmatpush3.msra.mxu1 %v706_v51  ;;  %998 = vmatpush3.msra.mxu0 %v738_v52 }
 0x2b7   :  { %964 = vmatprep.subr.mxu1 %v721_v53  ;;  %999 = vmatprep.subr.mxu0 %v753_v54  ;;  %v917_v54 = vld [vmem:[%s1324_s5 + $0x8] ss:$0 sm:$0xff] }
 0x2b8   :  { %965 = vmatpush3.msra.mxu1 %v705_v55  ;;  %1000 = vmatpush3.msra.mxu0 %v737_v56 }
 0x2b9   :  { %966 = vmatprep.subr.mxu1 %v720_v57  ;;  %1001 = vmatprep.subr.mxu0 %v752_v58 }
 0x2ba   :  { %967 = vmatpush3.msra.mxu1 %v704_v59  ;;  %1002 = vmatpush3.msra.mxu0 %v736_v60 }
 0x2bb   :  { %968 = vmatprep.subr.mxu1 %v719_v61  ;;  %1003 = vmatprep.subr.mxu0 %v751_v62 }
 0x2bc   :  { %969 = vmatpush3.msra.mxu1 %v703_v63  ;;  %1004 = vmatpush3.msra.mxu0 %v735_v0 }
 0x2bd   :  { %970 = vmatprep.subr.mxu1 %v718_v1  ;;  %1005 = vmatprep.subr.mxu0 %v750_v2 }
 0x2be   :  { %971 = vmatpush3.msra.mxu1 %v702_v3  ;;  %1006 = vmatpush3.msra.mxu0 %v734_v4 }
 0x2bf   :  { %972 = vmatprep.subr.mxu1 %v717_v5  ;;  %1007 = vmatprep.subr.mxu0 %v749_v6 }
 0x2c0   :  { %973 = vmatpush3.msra.mxu1 %v701_v7  ;;  %1008 = vmatpush3.msra.mxu0 %v733_v8 }
 0x2c1   :  { %974 = vmatprep.subr.mxu1 %v716_v9  ;;  %1009 = vmatprep.subr.mxu0 %v748_v10 }
 0x2c2   :  { %975 = vmatpush3.msra.mxu1 %v700_v11  ;;  %1010 = vmatpush3.msra.mxu0 %v732_v12 }
 0x2c3   :  { %976 = vmatprep.subr.mxu1 %v715_v13  ;;  %1011 = vmatprep.subr.mxu0 %v747_v14 }
 0x2c4   :  { %977 = vmatpush3.msra.mxu1 %v699_v15  ;;  %1012 = vmatpush3.msra.mxu0 %v731_v16 }
 0x2c5   :  { %978 = vmatprep.subr.mxu1 %v714_v19  ;;  %1013 = vmatprep.subr.mxu0 %v746_v21 }
 0x2c6   :  { %979 = vmatpush3.msra.mxu1 %v698_v22  ;;  %1014 = vmatpush3.msra.mxu0 %v730_v23 }
 0x2c7   :  { %980 = vmatprep.subr.mxu1 %v713_v24  ;;  %1015 = vmatprep.subr.mxu0 %v745_v25 }
 0x2c8   :  { %981 = vmatpush3.msra.mxu1 %v697_v26  ;;  %1016 = vmatpush3.msra.mxu0 %v729_v27 }
 0x2c9   :  { %982 = vmatprep.subr.mxu1 %v712_v28  ;;  %1017 = vmatprep.subr.mxu0 %v744_v29 }
 0x2ca   :  { %983 = vmatpush3.msra.mxu1 %v696_v30  ;;  %1018 = vmatpush3.msra.mxu0 %v728_v31 }
 0x36b   :  { %v608_v37 = vpop.f32.mrf.mxu1  ;;  %v679_v38 = vpop.f32.mrf.mxu0 }
 0x36c   :  { %v609_v41 = vadd.f32 %v608_v37, %v525_v35  ;;  %v680_v42 = vadd.f32 %v679_v38, %v533_v36 }
 0x36d   :  { %v610_v43 = vpop.f32.mrf.mxu1  ;;  %v681_v44 = vpop.f32.mrf.mxu0 }
 0x36e   :  { %v611_v45 = vadd.f32 %v610_v43, %v529_v39  ;;  %v682_v46 = vadd.f32 %v681_v44, %v537_v40  ;;  %vm684_vm5 = vcmp.ge.f32.partialorder %v609_v41, 0.0  ;;  %v688_v47 = vmul.f32 0.2, %v609_v41 }
 0x36f   :  { %vm686_vm6 = vcmp.ge.f32.partialorder %v680_v42, 0.0  ;;  %v690_v48 = vmul.f32 0.2, %v680_v42 }
 0x370   :  { %v689_v49 = vmul.f32 0.2, %v611_v45  ;;  %v691_v50 = vmul.f32 0.2, %v682_v46  ;;  %vm685_vm7 = vcmp.ge.f32.partialorder %v611_v45, 0.0  ;;  %vm687_vm8 = vcmp.ge.f32.partialorder %v682_v46, 0.0 }
 0x371   :  { %v692_v17 = vsel %vm684_vm5, %v609_v41, %v688_v47  ;;  %v694_v20 = vsel %vm686_vm6, %v680_v42, %v690_v48 }
 0x372   :  { %v693_v18 = vsel %vm685_vm7, %v611_v45, %v689_v49  ;;  %v695_v51 = vsel %vm687_vm8, %v682_v46, %v691_v50 }
 0x373   :  { %831 = vmatprep.mubr.f32.mxu1 %v693_v18  ;;  %901 = vmatprep.mubr.f32.mxu0 %v695_v51 }
 0x374   :  { %832 = vmatmul.mubr.f32.vlgmr.msra.gmra.mxu1 %v692_v17  ;;  %902 = vmatmul.mubr.f32.vlgmr.msra.gmra.mxu0 %v694_v20 }
 0x434   :  { %v984_v52 = vpop.f32.mrf.mxu1  ;;  %v1019_v53 = vpop.f32.mrf.mxu0 }
 0x436   :  { %v985_v55 = vpop.f32.mrf.mxu1  ;;  %v1020_v56 = vpop.f32.mrf.mxu0 }
 0x437   :  { %v986_v57 = vadd.f32 %v985_v55, %v984_v52  ;;  %v1021_v59 = vadd.f32 %v1020_v56, %v1019_v53 }
 0x439   :  { %v834_v58 = vadd.f32 %v986_v57, %v917_v54 }
 0x43b   :  { %v904_v60 = vadd.f32 %v1021_v59, %v834_v58 }
 0x43d   :  { %907 = vst [vmem:[%s1325_s6] sm:$0xff] %v904_v60 }
 0x43e   :  { %912 = vsyncpa [#allocation3], 1 }
 0x43f   :  { %913 = vsyncpa [#allocation5], 1 }
 0x440   :  { %914 = vsyncpa [#allocation8], 1 }

</bundles_post_ra>
